<compile_context>
chip_gen: v7x
topology: tpu7x:2x2x1
jax: 0.10.0
libtpu: 0.0.40
codegen_flags: <defaults>
</compile_context>

<pallas_src>
import functools

import jax
import jax.numpy as jnp
from jax.experimental import pallas as pl
from jax.experimental.pallas import tpu as pltpu

EPS = 1e-5
NEG_SLOPE = 0.01          # nn.LeakyReLU default
LANE = 128
VMEM_BUDGET = 24 * 1024 * 1024   # conservative; fits 32 MiB scoped VMEM on all gens


def _round_up(a, b):
    return (a + b - 1) // b * b


# ---------------------------------------------------------------------------
# Pass 1: fused complex conv (one MXU matmul per tile) + per-(b, c) stats
# ---------------------------------------------------------------------------
def _conv_stats_kernel(p_ref, w_ref, bias_ref, y_ref, stats_ref, *, cout, tile_n):
    t = pl.program_id(1)

    @pl.when(t == 0)
    def _init():
        stats_ref[...] = jnp.zeros_like(stats_ref)

    p = p_ref[0]            # (K, 2*tile_n) = [patches(x_re) | patches(x_im)]
    w = w_ref[...]          # (2*Cout, K)   = [w_re ; w_im]
    bias = bias_ref[...]    # (Cout, 2)     = [b_re - b_im, b_re + b_im]

    # One MXU pass yields all four real convolutions.
    res = jnp.dot(w, p, preferred_element_type=jnp.float32)   # (2*Cout, 2*tile_n)
    rr = res[:cout, :tile_n]     # conv_re(x_re)
    ri = res[:cout, tile_n:]     # conv_re(x_im)
    ir = res[cout:, :tile_n]     # conv_im(x_re)
    ii = res[cout:, tile_n:]     # conv_im(x_im)

    real = rr - ii + bias[:, 0:1]
    imag = ri + ir + bias[:, 1:2]

    y_ref[0, :, :tile_n] = real
    y_ref[0, :, tile_n:] = imag

    # Per-channel sum / sumsq (lane-axis reduce -> XLU slot, ~free next to MXU).
    # Padded (all-zero) patch columns contribute exactly `bias`; corrected in pass 2.
    stats_ref[0, :, 0:1] += jnp.sum(real, axis=1, keepdims=True)
    stats_ref[0, :, 1:2] += jnp.sum(real * real, axis=1, keepdims=True)
    stats_ref[0, :, 2:3] += jnp.sum(imag, axis=1, keepdims=True)
    stats_ref[0, :, 3:4] += jnp.sum(imag * imag, axis=1, keepdims=True)


# ---------------------------------------------------------------------------
# Pass 2: in-kernel BN fold (stats -> scale/shift) + affine + LeakyReLU
# ---------------------------------------------------------------------------
def _bn_lrelu_kernel(y_ref, stats_ref, gb_ref, bias_ref, o_ref,
                     *, tile_n, inv_n, pad_cols):
    stats = jnp.sum(stats_ref[...], axis=0)   # (Cout, 4): reduce over batch
    gb = gb_ref[...]                           # (Cout, 4): [g_re, beta_re, g_im, beta_im]
    bias = bias_ref[...]                       # (Cout, 2): [b_re - b_im, b_re + b_im]

    sum_re = stats[:, 0:1]
    ssq_re = stats[:, 1:2]
    sum_im = stats[:, 2:3]
    ssq_im = stats[:, 3:4]
    if pad_cols:  # static; exact correction for zero padded patch columns
        cr = bias[:, 0:1]
        ci = bias[:, 1:2]
        sum_re = sum_re - pad_cols * cr
        ssq_re = ssq_re - pad_cols * cr * cr
        sum_im = sum_im - pad_cols * ci
        ssq_im = ssq_im - pad_cols * ci * ci

    # NOTE: E[x^2]-E[x]^2 one-pass variance (clamped); fine for zero-ish means.
    mean_re = sum_re * inv_n
    mean_im = sum_im * inv_n
    var_re = jnp.maximum(ssq_re * inv_n - mean_re * mean_re, 0.0)
    var_im = jnp.maximum(ssq_im * inv_n - mean_im * mean_im, 0.0)
    scale_re = gb[:, 0:1] * jax.lax.rsqrt(var_re + EPS)
    shift_re = gb[:, 1:2] - mean_re * scale_re
    scale_im = gb[:, 2:3] * jax.lax.rsqrt(var_im + EPS)
    shift_im = gb[:, 3:4] - mean_im * scale_im

    y = y_ref[0]                               # (Cout, 2*tile_n) = [real | imag]
    r = y[:, :tile_n] * scale_re + shift_re
    i = y[:, tile_n:] * scale_im + shift_im
    o_ref[0, :, :tile_n] = jnp.where(r >= 0, r, NEG_SLOPE * r)
    o_ref[0, :, tile_n:] = jnp.where(i >= 0, i, NEG_SLOPE * i)


# ---------------------------------------------------------------------------
# Host glue: transposed im2col (K on sublanes, spatial dense on lanes)
# ---------------------------------------------------------------------------
def _im2col_T(xc, kh, kw, sh, sw, ph, pw, Ho, Wo, n_pad):
    """xc: (B, Cin, H, W) -> (B, Cin*kh*kw, n_pad); K ordered (Cin, kh, kw)."""
    B, Cin, _, _ = xc.shape
    xp = jnp.pad(xc, ((0, 0), (0, 0), (ph, ph), (pw, pw)))
    rows = []
    for i in range(kh):
        for j in range(kw):
            sl = xp[:, :, i:i + sh * (Ho - 1) + 1:sh, j:j + sw * (Wo - 1) + 1:sw]
            rows.append(sl.reshape(B, Cin, Ho * Wo))
    p = jnp.stack(rows, axis=2).reshape(B, Cin * kh * kw, Ho * Wo)
    if n_pad > Ho * Wo:
        p = jnp.pad(p, ((0, 0), (0, 0), (0, n_pad - Ho * Wo)))
    return p


def _pack_lanes(p_re, p_im, n_tiles, tile_n):
    """(B,K,n_pad) x2 -> (B,K,2*n_pad); per spatial tile t the lanes hold [re_t | im_t]."""
    B, K, n_pad = p_re.shape
    pr = p_re.reshape(B, K, n_tiles, 1, tile_n)
    pi = p_im.reshape(B, K, n_tiles, 1, tile_n)
    return jnp.concatenate([pr, pi], axis=3).reshape(B, K, 2 * n_pad)


@functools.partial(jax.jit, static_argnames=("kernel_size", "stride", "padding"))
def encoder_forward(x, params, kernel_size, stride, padding):
    """x: (B, Cin, H, W, 2) float32 -> (B, Cout, Ho, Wo, 2) float32."""
    B, Cin, H, W, _ = x.shape
    kh, kw = kernel_size
    sh, sw = stride
    ph, pw = padding
    Cout = params["w_re"].shape[0]
    K = Cin * kh * kw

    Ho = (H + 2 * ph - kh) // sh + 1
    Wo = (W + 2 * pw - kw) // sw + 1
    n_valid = Ho * Wo

    # VMEM-budget-aware spatial tile (pass 1 dominates: double-buffered packed
    # patch block + double-buffered packed conv output, all f32).
    bytes_per_col = 2 * 2 * 4 * (K + Cout)          # bufs * (re|im) * 4 B * rows
    tile_cap = max(LANE, (VMEM_BUDGET // bytes_per_col) // LANE * LANE)
    tile_n = min(_round_up(n_valid, LANE), tile_cap)
    n_pad = _round_up(n_valid, tile_n)
    n_tiles = n_pad // tile_n

    p_re = _im2col_T(x[..., 0], kh, kw, sh, sw, ph, pw, Ho, Wo, n_pad)
    p_im = _im2col_T(x[..., 1], kh, kw, sh, sw, ph, pw, Ho, Wo, n_pad)
    p = _pack_lanes(p_re, p_im, n_tiles, tile_n)                     # (B, K, 2*n_pad)

    # PyTorch OIHW weights -> stacked (2*Cout, K); K ordered (Cin, kh, kw).
    w = jnp.concatenate([params["w_re"].reshape(Cout, K),
                         params["w_im"].reshape(Cout, K)], axis=0)   # (2*Cout, K)
    bias2 = jnp.stack([params["b_re"] - params["b_im"],
                       params["b_re"] + params["b_im"]], axis=1)     # (Cout, 2)

    kernel1 = functools.partial(_conv_stats_kernel, cout=Cout, tile_n=tile_n)
    y, stats = pl.pallas_call(
        kernel1,
        grid=(B, n_tiles),
        in_specs=[
            pl.BlockSpec((1, K, 2 * tile_n), lambda b, t: (b, 0, t)),
            pl.BlockSpec((2 * Cout, K), lambda b, t: (0, 0)),
            pl.BlockSpec((Cout, 2), lambda b, t: (0, 0)),
        ],
        out_specs=(
            pl.BlockSpec((1, Cout, 2 * tile_n), lambda b, t: (b, 0, t)),
            pl.BlockSpec((1, Cout, 4), lambda b, t: (b, 0, 0)),   # resident accumulator
        ),
        out_shape=(
            jax.ShapeDtypeStruct((B, Cout, 2 * n_pad), jnp.float32),
            jax.ShapeDtypeStruct((B, Cout, 4), jnp.float32),
        ),
        compiler_params=pltpu.CompilerParams(
            dimension_semantics=("parallel", "arbitrary"),
            vmem_limit_bytes=32 * 1024 * 1024),
    )(p, w, bias2)

    gb = jnp.stack([params["gamma_re"], params["beta_re"],
                    params["gamma_im"], params["beta_im"]], axis=1)  # (Cout, 4)

    kernel2 = functools.partial(
        _bn_lrelu_kernel, tile_n=tile_n,
        inv_n=1.0 / float(B * n_valid),
        pad_cols=float(B * (n_pad - n_valid)))
    o = pl.pallas_call(
        kernel2,
        grid=(B, n_tiles),
        in_specs=[
            pl.BlockSpec((1, Cout, 2 * tile_n), lambda b, t: (b, 0, t)),
            pl.BlockSpec((B, Cout, 4), lambda b, t: (0, 0, 0)),
            pl.BlockSpec((Cout, 4), lambda b, t: (0, 0)),
            pl.BlockSpec((Cout, 2), lambda b, t: (0, 0)),
        ],
        out_specs=pl.BlockSpec((1, Cout, 2 * tile_n), lambda b, t: (b, 0, t)),
        out_shape=jax.ShapeDtypeStruct((B, Cout, 2 * n_pad), jnp.float32),
        input_output_aliases={0: 0},     # overwrite the conv intermediate in place
        compiler_params=pltpu.CompilerParams(
            dimension_semantics=("parallel", "parallel"),
            vmem_limit_bytes=32 * 1024 * 1024),
    )(y, stats, gb, bias2)

    # Unpack lane-packed [real | imag] tiles; the single (..., 2) interleave is
    # inherent to matching the PyTorch output layout and is done exactly once.
    o = o.reshape(B, Cout, n_tiles, 2, tile_n)
    o_re = o[:, :, :, 0, :].reshape(B, Cout, n_pad)[:, :, :n_valid].reshape(B, Cout, Ho, Wo)
    o_im = o[:, :, :, 1, :].reshape(B, Cout, n_pad)[:, :, :n_valid].reshape(B, Cout, Ho, Wo)
    return jnp.stack((o_re, o_im), axis=-1)


# ---------------------------------------------------------------------------
# Pure-JAX reference (mirrors the PyTorch graph) for verification
# ---------------------------------------------------------------------------
def encoder_reference(x, params, stride, padding):
    def conv(xr, w, b):
        o = jax.lax.conv_general_dilated(
            xr, w, window_strides=stride,
            padding=[(padding[0], padding[0]), (padding[1], padding[1])],
            dimension_numbers=("NCHW", "OIHW", "NCHW"))
        return o + b[None, :, None, None]

    xr, xi = x[..., 0], x[..., 1]
    real = conv(xr, params["w_re"], params["b_re"]) - conv(xi, params["w_im"], params["b_im"])
    imag = conv(xi, params["w_re"], params["b_re"]) + conv(xr, params["w_im"], params["b_im"])

    def bn(y, g, b):
        mean = y.mean(axis=(0, 2, 3), keepdims=True)
        var = ((y - mean) ** 2).mean(axis=(0, 2, 3), keepdims=True)
        yhat = (y - mean) / jnp.sqrt(var + EPS)
        return yhat * g[None, :, None, None] + b[None, :, None, None]

    real = bn(real, params["gamma_re"], params["beta_re"])
    imag = bn(imag, params["gamma_im"], params["beta_im"])
    lrelu = lambda v: jnp.where(v >= 0, v, NEG_SLOPE * v)
    return jnp.stack((lrelu(real), lrelu(imag)), axis=-1)


# ---------------------------------------------------------------------------
if __name__ == "__main__":
    # Encoder(in=4, out=8, kernel=(3,3), stride=(2,1), complex=True)
    B, Cin, Cout, H, W = 2, 4, 8, 16, 16
    kernel_size = (3, 3)
    stride = (2, 1)
    padding = tuple((k - 1) // 2 for k in kernel_size)

    key = jax.random.PRNGKey(0)
    ks = jax.random.split(key, 9)
    params = {
        "w_re": 0.1 * jax.random.normal(ks[0], (Cout, Cin, *kernel_size), jnp.float32),
        "w_im": 0.1 * jax.random.normal(ks[1], (Cout, Cin, *kernel_size), jnp.float32),
        "b_re": 0.1 * jax.random.normal(ks[2], (Cout,), jnp.float32),
        "b_im": 0.1 * jax.random.normal(ks[3], (Cout,), jnp.float32),
        "gamma_re": 1.0 + 0.1 * jax.random.normal(ks[4], (Cout,), jnp.float32),
        "beta_re": 0.1 * jax.random.normal(ks[5], (Cout,), jnp.float32),
        "gamma_im": 1.0 + 0.1 * jax.random.normal(ks[6], (Cout,), jnp.float32),
        "beta_im": 0.1 * jax.random.normal(ks[7], (Cout,), jnp.float32),
    }
    x = jax.random.normal(ks[8], (B, Cin, H, W, 2), jnp.float32)

    out = encoder_forward(x, params, kernel_size, stride, padding)
    out = jax.block_until_ready(out)

    ref = encoder_reference(x, params, stride, padding)
    assert out.shape == ref.shape, (out.shape, ref.shape)
    err = float(jnp.max(jnp.abs(out - ref)))
    assert err < 2e-4, err
    print("KERNEL_OK")
</pallas_src>

<mosaic_0001>
module attributes {stable_mosaic.version = 11 : i64} {
  func.func @_conv_stats_kernel(%arg0: i32, %arg1: i32, %arg2: memref<1x36x256xf32, #tpu.memory_space<vmem>>, %arg3: memref<16x36xf32, #tpu.memory_space<vmem>>, %arg4: memref<8x2xf32, #tpu.memory_space<vmem>>, %arg5: memref<1x8x256xf32, #tpu.memory_space<vmem>>, %arg6: memref<1x8x4xf32, #tpu.memory_space<vmem>>) attributes {dimension_semantics = [#tpu.dimension_semantics<parallel>, #tpu.dimension_semantics<arbitrary>], iteration_bounds = array<i64: 2, 1>, scalar_prefetch = 0 : i64, scratch_operands = 0 : i64, tpu.core_type = #tpu.core_type<tc>, window_params = [{transform_indices = @transform_0, window_bounds = array<i64: 1, 36, 256>}, {pipeline_mode = #tpu.pipeline_mode<synchronous>, transform_indices = @transform_1, window_bounds = array<i64: 16, 36>}, {pipeline_mode = #tpu.pipeline_mode<synchronous>, transform_indices = @transform_2, window_bounds = array<i64: 8, 2>}, {transform_indices = @transform_3, window_bounds = array<i64: 1, 8, 256>}, {transform_indices = @transform_4, window_bounds = array<i64: 1, 8, 4>}]} {
    %c0_i32 = arith.constant 0 : i32
    %0 = arith.cmpi eq, %arg1, %c0_i32 : i32
    %1 = arith.extui %0 : i1 to i32
    %c0_i32_0 = arith.constant 0 : i32
    %2 = arith.cmpi ne, %1, %c0_i32_0 : i32
    scf.if %2 {
      %cst_37 = arith.constant 0.000000e+00 : f32
      %60 = vector.broadcast %cst_37 : f32 to vector<1x8x4xf32>
      %c0_38 = arith.constant 0 : index
      %c0_39 = arith.constant 0 : index
      %c0_40 = arith.constant 0 : index
      %61 = vector.load %arg6[%c0_38, %c0_39, %c0_40] : memref<1x8x4xf32, #tpu.memory_space<vmem>>, vector<1x8x4xf32>
      tpu.vector_store %arg6[%c0_38, %c0_39, %c0_40], %60 {strides = array<i32>} : memref<1x8x4xf32, #tpu.memory_space<vmem>>, vector<1x8x4xf32>,
    } else {
    }
    %c0 = arith.constant 0 : index
    %c0_1 = arith.constant 0 : index
    %c0_2 = arith.constant 0 : index
    %3 = vector.load %arg2[%c0, %c0_1, %c0_2] : memref<1x36x256xf32, #tpu.memory_space<vmem>>, vector<1x36x256xf32>
    %4 = vector.shape_cast %3 : vector<1x36x256xf32> to vector<36x256xf32>
    %c0_3 = arith.constant 0 : index
    %c0_4 = arith.constant 0 : index
    %5 = vector.load %arg3[%c0_3, %c0_4] : memref<16x36xf32, #tpu.memory_space<vmem>>, vector<16x36xf32>
    %c0_5 = arith.constant 0 : index
    %c0_6 = arith.constant 0 : index
    %6 = vector.load %arg4[%c0_5, %c0_6] : memref<8x2xf32, #tpu.memory_space<vmem>>, vector<8x2xf32>
    %cst = arith.constant dense<0.000000e+00> : vector<16x256xf32>
    %7 = tpu.matmul %5, %4, %cst {dimension_numbers = #tpu.dot_dimension_numbers<[1], [0], [0], [1], [0, 0, 1, 1], [], []>} : vector<16x36xf32>, vector<36x256xf32>, vector<16x256xf32> -> vector<16x256xf32>
    %8 = vector.extract_strided_slice %7 {offsets = [0, 0], sizes = [8, 128], strides = [1, 1]} : vector<16x256xf32> to vector<8x128xf32>
    %9 = vector.extract_strided_slice %7 {offsets = [0, 128], sizes = [8, 128], strides = [1, 1]} : vector<16x256xf32> to vector<8x128xf32>
    %10 = vector.extract_strided_slice %7 {offsets = [8, 0], sizes = [8, 128], strides = [1, 1]} : vector<16x256xf32> to vector<8x128xf32>
    %11 = vector.extract_strided_slice %7 {offsets = [8, 128], sizes = [8, 128], strides = [1, 1]} : vector<16x256xf32> to vector<8x128xf32>
    %12 = arith.subf %8, %11 : vector<8x128xf32>
    %13 = vector.extract_strided_slice %6 {offsets = [0, 0], sizes = [8, 1], strides = [1, 1]} : vector<8x2xf32> to vector<8x1xf32>
    %14 = vector.broadcast %13 : vector<8x1xf32> to vector<8x128xf32>
    %15 = arith.addf %12, %14 : vector<8x128xf32>
    %16 = arith.addf %9, %10 : vector<8x128xf32>
    %17 = vector.extract_strided_slice %6 {offsets = [0, 1], sizes = [8, 1], strides = [1, 1]} : vector<8x2xf32> to vector<8x1xf32>
    %18 = vector.broadcast %17 : vector<8x1xf32> to vector<8x128xf32>
    %19 = arith.addf %16, %18 : vector<8x128xf32>
    %c0_7 = arith.constant 0 : index
    %c0_8 = arith.constant 0 : index
    %c0_9 = arith.constant 0 : index
    %20 = vector.load %arg5[%c0_7, %c0_8, %c0_9] : memref<1x8x256xf32, #tpu.memory_space<vmem>>, vector<1x8x128xf32>
    %21 = vector.shape_cast %20 : vector<1x8x128xf32> to vector<8x128xf32>
    %22 = vector.shape_cast %15 : vector<8x128xf32> to vector<1x8x128xf32>
    tpu.vector_store %arg5[%c0_7, %c0_8, %c0_9], %22 {strides = array<i32>} : memref<1x8x256xf32, #tpu.memory_space<vmem>>, vector<1x8x128xf32>,
    %c0_10 = arith.constant 0 : index
    %c0_11 = arith.constant 0 : index
    %c128 = arith.constant 128 : index
    %23 = vector.load %arg5[%c0_10, %c0_11, %c128] : memref<1x8x256xf32, #tpu.memory_space<vmem>>, vector<1x8x128xf32>
    %24 = vector.shape_cast %23 : vector<1x8x128xf32> to vector<8x128xf32>
    %25 = vector.shape_cast %19 : vector<8x128xf32> to vector<1x8x128xf32>
    tpu.vector_store %arg5[%c0_10, %c0_11, %c128], %25 {strides = array<i32>} : memref<1x8x256xf32, #tpu.memory_space<vmem>>, vector<1x8x128xf32>,
    %c0_12 = arith.constant 0 : index
    %c0_13 = arith.constant 0 : index
    %c0_14 = arith.constant 0 : index
    %26 = vector.load %arg6[%c0_12, %c0_13, %c0_14] : memref<1x8x4xf32, #tpu.memory_space<vmem>>, vector<1x8x1xf32>
    %27 = vector.shape_cast %26 : vector<1x8x1xf32> to vector<8x1xf32>
    %cst_15 = arith.constant dense<0.000000e+00> : vector<8xf32>
    %28 = vector.multi_reduction <add>, %15, %cst_15 [1] : vector<8x128xf32> to vector<8xf32>
    %29 = vector.shape_cast %28 : vector<8xf32> to vector<8x1xf32>
    %30 = arith.addf %27, %29 : vector<8x1xf32>
    %c0_16 = arith.constant 0 : index
    %c0_17 = arith.constant 0 : index
    %c0_18 = arith.constant 0 : index
    %31 = vector.load %arg6[%c0_16, %c0_17, %c0_18] : memref<1x8x4xf32, #tpu.memory_space<vmem>>, vector<1x8x1xf32>
    %32 = vector.shape_cast %31 : vector<1x8x1xf32> to vector<8x1xf32>
    %33 = vector.shape_cast %30 : vector<8x1xf32> to vector<1x8x1xf32>
    tpu.vector_store %arg6[%c0_16, %c0_17, %c0_18], %33 {strides = array<i32>} : memref<1x8x4xf32, #tpu.memory_space<vmem>>, vector<1x8x1xf32>,
    %c0_19 = arith.constant 0 : index
    %c0_20 = arith.constant 0 : index
    %c1 = arith.constant 1 : index
    %34 = vector.load %arg6[%c0_19, %c0_20, %c1] : memref<1x8x4xf32, #tpu.memory_space<vmem>>, vector<1x8x1xf32>
    %35 = vector.shape_cast %34 : vector<1x8x1xf32> to vector<8x1xf32>
    %36 = arith.mulf %15, %15 : vector<8x128xf32>
    %cst_21 = arith.constant dense<0.000000e+00> : vector<8xf32>
    %37 = vector.multi_reduction <add>, %36, %cst_21 [1] : vector<8x128xf32> to vector<8xf32>
    %38 = vector.shape_cast %37 : vector<8xf32> to vector<8x1xf32>
    %39 = arith.addf %35, %38 : vector<8x1xf32>
    %c0_22 = arith.constant 0 : index
    %c0_23 = arith.constant 0 : index
    %c1_24 = arith.constant 1 : index
    %40 = vector.load %arg6[%c0_22, %c0_23, %c1_24] : memref<1x8x4xf32, #tpu.memory_space<vmem>>, vector<1x8x1xf32>
    %41 = vector.shape_cast %40 : vector<1x8x1xf32> to vector<8x1xf32>
    %42 = vector.shape_cast %39 : vector<8x1xf32> to vector<1x8x1xf32>
    tpu.vector_store %arg6[%c0_22, %c0_23, %c1_24], %42 {strides = array<i32>} : memref<1x8x4xf32, #tpu.memory_space<vmem>>, vector<1x8x1xf32>,
    %c0_25 = arith.constant 0 : index
    %c0_26 = arith.constant 0 : index
    %c2 = arith.constant 2 : index
    %43 = vector.load %arg6[%c0_25, %c0_26, %c2] : memref<1x8x4xf32, #tpu.memory_space<vmem>>, vector<1x8x1xf32>
    %44 = vector.shape_cast %43 : vector<1x8x1xf32> to vector<8x1xf32>
    %cst_27 = arith.constant dense<0.000000e+00> : vector<8xf32>
    %45 = vector.multi_reduction <add>, %19, %cst_27 [1] : vector<8x128xf32> to vector<8xf32>
    %46 = vector.shape_cast %45 : vector<8xf32> to vector<8x1xf32>
    %47 = arith.addf %44, %46 : vector<8x1xf32>
    %c0_28 = arith.constant 0 : index
    %c0_29 = arith.constant 0 : index
    %c2_30 = arith.constant 2 : index
    %48 = vector.load %arg6[%c0_28, %c0_29, %c2_30] : memref<1x8x4xf32, #tpu.memory_space<vmem>>, vector<1x8x1xf32>
    %49 = vector.shape_cast %48 : vector<1x8x1xf32> to vector<8x1xf32>
    %50 = vector.shape_cast %47 : vector<8x1xf32> to vector<1x8x1xf32>
    tpu.vector_store %arg6[%c0_28, %c0_29, %c2_30], %50 {strides = array<i32>} : memref<1x8x4xf32, #tpu.memory_space<vmem>>, vector<1x8x1xf32>,
    %c0_31 = arith.constant 0 : index
    %c0_32 = arith.constant 0 : index
    %c3 = arith.constant 3 : index
    %51 = vector.load %arg6[%c0_31, %c0_32, %c3] : memref<1x8x4xf32, #tpu.memory_space<vmem>>, vector<1x8x1xf32>
    %52 = vector.shape_cast %51 : vector<1x8x1xf32> to vector<8x1xf32>
    %53 = arith.mulf %19, %19 : vector<8x128xf32>
    %cst_33 = arith.constant dense<0.000000e+00> : vector<8xf32>
    %54 = vector.multi_reduction <add>, %53, %cst_33 [1] : vector<8x128xf32> to vector<8xf32>
    %55 = vector.shape_cast %54 : vector<8xf32> to vector<8x1xf32>
    %56 = arith.addf %52, %55 : vector<8x1xf32>
    %c0_34 = arith.constant 0 : index
    %c0_35 = arith.constant 0 : index
    %c3_36 = arith.constant 3 : index
    %57 = vector.load %arg6[%c0_34, %c0_35, %c3_36] : memref<1x8x4xf32, #tpu.memory_space<vmem>>, vector<1x8x1xf32>
    %58 = vector.shape_cast %57 : vector<1x8x1xf32> to vector<8x1xf32>
    %59 = vector.shape_cast %56 : vector<8x1xf32> to vector<1x8x1xf32>
    tpu.vector_store %arg6[%c0_34, %c0_35, %c3_36], %59 {strides = array<i32>} : memref<1x8x4xf32, #tpu.memory_space<vmem>>, vector<1x8x1xf32>,
    return
  }
  func.func @transform_0(%arg0: i32, %arg1: i32) -> (i32, i32, i32) {
    %c0_i32 = arith.constant 0 : i32
    %c0_i32_0 = arith.constant 0 : i32
    return %arg0, %c0_i32, %arg1 : i32, i32, i32
  }
  func.func @transform_1(%arg0: i32, %arg1: i32) -> (i32, i32) {
    %c0_i32 = arith.constant 0 : i32
    %c0_i32_0 = arith.constant 0 : i32
    %c0_i32_1 = arith.constant 0 : i32
    return %c0_i32, %c0_i32_0 : i32, i32
  }
  func.func @transform_2(%arg0: i32, %arg1: i32) -> (i32, i32) {
    %c0_i32 = arith.constant 0 : i32
    %c0_i32_0 = arith.constant 0 : i32
    %c0_i32_1 = arith.constant 0 : i32
    return %c0_i32, %c0_i32_0 : i32, i32
  }
  func.func @transform_3(%arg0: i32, %arg1: i32) -> (i32, i32, i32) {
    %c0_i32 = arith.constant 0 : i32
    %c0_i32_0 = arith.constant 0 : i32
    return %arg0, %c0_i32, %arg1 : i32, i32, i32
  }
  func.func @transform_4(%arg0: i32, %arg1: i32) -> (i32, i32, i32) {
    %c0_i32 = arith.constant 0 : i32
    %c0_i32_0 = arith.constant 0 : i32
    %c0_i32_1 = arith.constant 0 : i32
    return %arg0, %c0_i32, %c0_i32_0 : i32, i32, i32
  }
}

module attributes {stable_mosaic.version = 11 : i64} {
  func.func @_bn_lrelu_kernel(%arg0: i32, %arg1: i32, %arg2: memref<1x8x256xf32, #tpu.memory_space<vmem>>, %arg3: memref<2x8x4xf32, #tpu.memory_space<vmem>>, %arg4: memref<8x4xf32, #tpu.memory_space<vmem>>, %arg5: memref<8x2xf32, #tpu.memory_space<vmem>>, %arg6: memref<1x8x256xf32, #tpu.memory_space<vmem>>) attributes {dimension_semantics = [#tpu.dimension_semantics<parallel>, #tpu.dimension_semantics<parallel>], iteration_bounds = array<i64: 2, 1>, scalar_prefetch = 0 : i64, scratch_operands = 0 : i64, tpu.core_type = #tpu.core_type<tc>, window_params = [{transform_indices = @transform_0, window_bounds = array<i64: 1, 8, 256>}, {pipeline_mode = #tpu.pipeline_mode<synchronous>, transform_indices = @transform_1, window_bounds = array<i64: 2, 8, 4>}, {pipeline_mode = #tpu.pipeline_mode<synchronous>, transform_indices = @transform_2, window_bounds = array<i64: 8, 4>}, {pipeline_mode = #tpu.pipeline_mode<synchronous>, transform_indices = @transform_3, window_bounds = array<i64: 8, 2>}, {transform_indices = @transform_4, window_bounds = array<i64: 1, 8, 256>}]} {
    %c0 = arith.constant 0 : index
    %c0_0 = arith.constant 0 : index
    %c0_1 = arith.constant 0 : index
    %0 = vector.load %arg3[%c0, %c0_0, %c0_1] : memref<2x8x4xf32, #tpu.memory_space<vmem>>, vector<2x8x4xf32>
    %cst = arith.constant dense<0.000000e+00> : vector<8x4xf32>
    %1 = vector.multi_reduction <add>, %0, %cst [0] : vector<2x8x4xf32> to vector<8x4xf32>
    %c0_2 = arith.constant 0 : index
    %c0_3 = arith.constant 0 : index
    %2 = vector.load %arg4[%c0_2, %c0_3] : memref<8x4xf32, #tpu.memory_space<vmem>>, vector<8x4xf32>
    %3 = vector.extract_strided_slice %1 {offsets = [0, 0], sizes = [8, 1], strides = [1, 1]} : vector<8x4xf32> to vector<8x1xf32>
    %4 = vector.extract_strided_slice %1 {offsets = [0, 1], sizes = [8, 1], strides = [1, 1]} : vector<8x4xf32> to vector<8x1xf32>
    %5 = vector.extract_strided_slice %1 {offsets = [0, 2], sizes = [8, 1], strides = [1, 1]} : vector<8x4xf32> to vector<8x1xf32>
    %6 = vector.extract_strided_slice %1 {offsets = [0, 3], sizes = [8, 1], strides = [1, 1]} : vector<8x4xf32> to vector<8x1xf32>
    %cst_4 = arith.constant 3.906250e-03 : f32
    %7 = vector.broadcast %cst_4 : f32 to vector<8x1xf32>
    %8 = arith.mulf %3, %7 : vector<8x1xf32>
    %cst_5 = arith.constant 3.906250e-03 : f32
    %9 = vector.broadcast %cst_5 : f32 to vector<8x1xf32>
    %10 = arith.mulf %5, %9 : vector<8x1xf32>
    %cst_6 = arith.constant 3.906250e-03 : f32
    %11 = vector.broadcast %cst_6 : f32 to vector<8x1xf32>
    %12 = arith.mulf %4, %11 : vector<8x1xf32>
    %13 = arith.mulf %8, %8 : vector<8x1xf32>
    %14 = arith.subf %12, %13 : vector<8x1xf32>
    %cst_7 = arith.constant 0.000000e+00 : f32
    %15 = vector.broadcast %cst_7 : f32 to vector<8x1xf32>
    %16 = arith.maximumf %14, %15 : vector<8x1xf32>
    %cst_8 = arith.constant 3.906250e-03 : f32
    %17 = vector.broadcast %cst_8 : f32 to vector<8x1xf32>
    %18 = arith.mulf %6, %17 : vector<8x1xf32>
    %19 = arith.mulf %10, %10 : vector<8x1xf32>
    %20 = arith.subf %18, %19 : vector<8x1xf32>
    %cst_9 = arith.constant 0.000000e+00 : f32
    %21 = vector.broadcast %cst_9 : f32 to vector<8x1xf32>
    %22 = arith.maximumf %20, %21 : vector<8x1xf32>
    %23 = vector.extract_strided_slice %2 {offsets = [0, 0], sizes = [8, 1], strides = [1, 1]} : vector<8x4xf32> to vector<8x1xf32>
    %cst_10 = arith.constant 9.99999974E-6 : f32
    %24 = vector.broadcast %cst_10 : f32 to vector<8x1xf32>
    %25 = arith.addf %16, %24 : vector<8x1xf32>
    %26 = math.rsqrt %25 : vector<8x1xf32>
    %27 = arith.mulf %23, %26 : vector<8x1xf32>
    %28 = vector.extract_strided_slice %2 {offsets = [0, 1], sizes = [8, 1], strides = [1, 1]} : vector<8x4xf32> to vector<8x1xf32>
    %29 = arith.mulf %8, %27 : vector<8x1xf32>
    %30 = arith.subf %28, %29 : vector<8x1xf32>
    %31 = vector.extract_strided_slice %2 {offsets = [0, 2], sizes = [8, 1], strides = [1, 1]} : vector<8x4xf32> to vector<8x1xf32>
    %cst_11 = arith.constant 9.99999974E-6 : f32
    %32 = vector.broadcast %cst_11 : f32 to vector<8x1xf32>
    %33 = arith.addf %22, %32 : vector<8x1xf32>
    %34 = math.rsqrt %33 : vector<8x1xf32>
    %35 = arith.mulf %31, %34 : vector<8x1xf32>
    %36 = vector.extract_strided_slice %2 {offsets = [0, 3], sizes = [8, 1], strides = [1, 1]} : vector<8x4xf32> to vector<8x1xf32>
    %37 = arith.mulf %10, %35 : vector<8x1xf32>
    %38 = arith.subf %36, %37 : vector<8x1xf32>
    %c0_12 = arith.constant 0 : index
    %c0_13 = arith.constant 0 : index
    %c0_14 = arith.constant 0 : index
    %39 = vector.load %arg2[%c0_12, %c0_13, %c0_14] : memref<1x8x256xf32, #tpu.memory_space<vmem>>, vector<1x8x256xf32>
    %40 = vector.shape_cast %39 : vector<1x8x256xf32> to vector<8x256xf32>
    %41 = vector.extract_strided_slice %40 {offsets = [0, 0], sizes = [8, 128], strides = [1, 1]} : vector<8x256xf32> to vector<8x128xf32>
    %42 = vector.broadcast %27 : vector<8x1xf32> to vector<8x128xf32>
    %43 = arith.mulf %41, %42 : vector<8x128xf32>
    %44 = vector.broadcast %30 : vector<8x1xf32> to vector<8x128xf32>
    %45 = arith.addf %43, %44 : vector<8x128xf32>
    %46 = vector.extract_strided_slice %40 {offsets = [0, 128], sizes = [8, 128], strides = [1, 1]} : vector<8x256xf32> to vector<8x128xf32>
    %47 = vector.broadcast %35 : vector<8x1xf32> to vector<8x128xf32>
    %48 = arith.mulf %46, %47 : vector<8x128xf32>
    %49 = vector.broadcast %38 : vector<8x1xf32> to vector<8x128xf32>
    %50 = arith.addf %48, %49 : vector<8x128xf32>
    %cst_15 = arith.constant 0.000000e+00 : f32
    %51 = vector.broadcast %cst_15 : f32 to vector<8x128xf32>
    %52 = arith.cmpf oge, %45, %51 : vector<8x128xf32>
    %cst_16 = arith.constant 0.00999999977 : f32
    %53 = vector.broadcast %cst_16 : f32 to vector<8x128xf32>
    %54 = arith.mulf %53, %45 : vector<8x128xf32>
    %55 = arith.select %52, %45, %54 : vector<8x128xi1>, vector<8x128xf32>
    %c0_17 = arith.constant 0 : index
    %c0_18 = arith.constant 0 : index
    %c0_19 = arith.constant 0 : index
    %56 = vector.load %arg6[%c0_17, %c0_18, %c0_19] : memref<1x8x256xf32, #tpu.memory_space<vmem>>, vector<1x8x128xf32>
    %57 = vector.shape_cast %56 : vector<1x8x128xf32> to vector<8x128xf32>
    %58 = vector.shape_cast %55 : vector<8x128xf32> to vector<1x8x128xf32>
    tpu.vector_store %arg6[%c0_17, %c0_18, %c0_19], %58 {strides = array<i32>} : memref<1x8x256xf32, #tpu.memory_space<vmem>>, vector<1x8x128xf32>,
    %cst_20 = arith.constant 0.000000e+00 : f32
    %59 = vector.broadcast %cst_20 : f32 to vector<8x128xf32>
    %60 = arith.cmpf oge, %50, %59 : vector<8x128xf32>
    %cst_21 = arith.constant 0.00999999977 : f32
    %61 = vector.broadcast %cst_21 : f32 to vector<8x128xf32>
    %62 = arith.mulf %61, %50 : vector<8x128xf32>
    %63 = arith.select %60, %50, %62 : vector<8x128xi1>, vector<8x128xf32>
    %c0_22 = arith.constant 0 : index
    %c0_23 = arith.constant 0 : index
    %c128 = arith.constant 128 : index
    %64 = vector.load %arg6[%c0_22, %c0_23, %c128] : memref<1x8x256xf32, #tpu.memory_space<vmem>>, vector<1x8x128xf32>
    %65 = vector.shape_cast %64 : vector<1x8x128xf32> to vector<8x128xf32>
    %66 = vector.shape_cast %63 : vector<8x128xf32> to vector<1x8x128xf32>
    tpu.vector_store %arg6[%c0_22, %c0_23, %c128], %66 {strides = array<i32>} : memref<1x8x256xf32, #tpu.memory_space<vmem>>, vector<1x8x128xf32>,
    return
  }
  func.func @transform_0(%arg0: i32, %arg1: i32) -> (i32, i32, i32) {
    %c0_i32 = arith.constant 0 : i32
    %c0_i32_0 = arith.constant 0 : i32
    return %arg0, %c0_i32, %arg1 : i32, i32, i32
  }
  func.func @transform_1(%arg0: i32, %arg1: i32) -> (i32, i32, i32) {
    %c0_i32 = arith.constant 0 : i32
    %c0_i32_0 = arith.constant 0 : i32
    %c0_i32_1 = arith.constant 0 : i32
    %c0_i32_2 = arith.constant 0 : i32
    return %c0_i32, %c0_i32_0, %c0_i32_1 : i32, i32, i32
  }
  func.func @transform_2(%arg0: i32, %arg1: i32) -> (i32, i32) {
    %c0_i32 = arith.constant 0 : i32
    %c0_i32_0 = arith.constant 0 : i32
    %c0_i32_1 = arith.constant 0 : i32
    return %c0_i32, %c0_i32_0 : i32, i32
  }
  func.func @transform_3(%arg0: i32, %arg1: i32) -> (i32, i32) {
    %c0_i32 = arith.constant 0 : i32
    %c0_i32_0 = arith.constant 0 : i32
    %c0_i32_1 = arith.constant 0 : i32
    return %c0_i32, %c0_i32_0 : i32, i32
  }
  func.func @transform_4(%arg0: i32, %arg1: i32) -> (i32, i32, i32) {
    %c0_i32 = arith.constant 0 : i32
    %c0_i32_0 = arith.constant 0 : i32
    return %arg0, %c0_i32, %arg1 : i32, i32, i32
  }
}

</mosaic_0001>

<bundles_post_ra>
// kernel: squeeze.6
= control target key start
LH: loop header
LB: loop body
LE: loop exit
PB: predicated region body
PF: predicated region fallthrough
CT: control target
= control target key end

     0   :  { %vm3_vm0 = vcmask 130048   ;;  %s178_s10 = smov 112   ;;  %s179_s19 = smov 80   ;;  %s328_s0 = inlined_call_operand.vmem [shape: f32[2,8,1,1,128], index: 0, kind: input, shape index: {}]   ;;  %s329_s1 = inlined_call_operand.vmem [shape: f32[2,8,8,16,1], index: 1, kind: output, shape index: {}]  }
   0x1   :  { %v30_v0 = vld [vmem:[%s328_s0] sm:$0xff]   ;;  %v142_v1 = vld [vmem:[%s328_s0 + $0x8] sm:$0xff]   ;;  %s177_s0 = smov 96   ;;  %s180_s20 = smov 64  }
   0x2   :  { %31 = vrot.lane.b32.xlu1 %v30_v0, %s177_s0  ;;  %14 = vrot.lane.b32.xlu0 %v30_v0, %s178_s10  ;;  %4 = vst.msk [vmem:[%s329_s1] ss:$8 sm:$0xf] %vm3_vm0, %v30_v0   ;;  %5 = vst.msk [vmem:[%s329_s1] ss:$8 sm:$0xf0] %vm3_vm0, %v30_v0  }
   0x3   :  { %133 = vst.msk [vmem:[%s329_s1 + $0x40] ss:$8 sm:$0xf] %vm3_vm0, %v142_v1   ;;  %134 = vst.msk [vmem:[%s329_s1 + $0x40] ss:$8 sm:$0xf0] %vm3_vm0, %v142_v1  }
   0x4   :  { %s181_s21 = smov 48   ;;  %s182_s22 = smov 32  }
   0x5   :  { %s183_s23 = smov 16  }
   0x6   :  { %40 = vrot.lane.b32.xlu1 %v142_v1, %s177_s0  ;;  %23 = vrot.lane.b32.xlu0 %v142_v1, %s178_s10 }
   0xa   :  { %57 = vrot.lane.b32.xlu1 %v142_v1, %s179_s19  ;;  %48 = vrot.lane.b32.xlu0 %v30_v0, %s179_s19 }
   0xe   :  { %74 = vrot.lane.b32.xlu1 %v142_v1, %s180_s20  ;;  %65 = vrot.lane.b32.xlu0 %v30_v0, %s180_s20 }
  0x12   :  { %91 = vrot.lane.b32.xlu1 %v142_v1, %s181_s21  ;;  %82 = vrot.lane.b32.xlu0 %v30_v0, %s181_s21 }
  0x16   :  { %108 = vrot.lane.b32.xlu1 %v142_v1, %s182_s22  ;;  %99 = vrot.lane.b32.xlu0 %v30_v0, %s182_s22 }
  0x1a   :  { %125 = vrot.lane.b32.xlu1 %v142_v1, %s183_s23  ;;  %116 = vrot.lane.b32.xlu0 %v30_v0, %s183_s23 }
  0x74   :  { %v32_v2 = vpop.permute.xlu1 %31   ;;  %v15_v3 = vpop.permute.xlu0 %14  }
  0x75   :  { %140 = vst.msk [vmem:[%s329_s1 + $0x2] ss:$8 sm:$0xf] %vm3_vm0, %v32_v2   ;;  %141 = vst.msk [vmem:[%s329_s1 + $0x2] ss:$8 sm:$0xf0] %vm3_vm0, %v32_v2  }
  0x76   :  { %135 = vst.msk [vmem:[%s329_s1 + $0x1] ss:$8 sm:$0xf] %vm3_vm0, %v15_v3   ;;  %136 = vst.msk [vmem:[%s329_s1 + $0x1] ss:$8 sm:$0xf0] %vm3_vm0, %v15_v3  }
  0x78   :  { %v41_v4 = vpop.permute.xlu1 %40   ;;  %v24_v5 = vpop.permute.xlu0 %23  }
  0x79   :  { %143 = vst.msk [vmem:[%s329_s1 + $0x42] ss:$8 sm:$0xf] %vm3_vm0, %v41_v4   ;;  %144 = vst.msk [vmem:[%s329_s1 + $0x42] ss:$8 sm:$0xf0] %vm3_vm0, %v41_v4  }
  0x7a   :  { %138 = vst.msk [vmem:[%s329_s1 + $0x41] ss:$8 sm:$0xf] %vm3_vm0, %v24_v5   ;;  %139 = vst.msk [vmem:[%s329_s1 + $0x41] ss:$8 sm:$0xf0] %vm3_vm0, %v24_v5  }
  0x7c   :  { %v58_v6 = vpop.permute.xlu1 %57   ;;  %v49_v7 = vpop.permute.xlu0 %48  }
  0x7d   :  { %148 = vst.msk [vmem:[%s329_s1 + $0x43] ss:$8 sm:$0xf] %vm3_vm0, %v58_v6   ;;  %149 = vst.msk [vmem:[%s329_s1 + $0x43] ss:$8 sm:$0xf0] %vm3_vm0, %v58_v6  }
  0x7e   :  { %145 = vst.msk [vmem:[%s329_s1 + $0x3] ss:$8 sm:$0xf] %vm3_vm0, %v49_v7   ;;  %146 = vst.msk [vmem:[%s329_s1 + $0x3] ss:$8 sm:$0xf0] %vm3_vm0, %v49_v7  }
  0x80   :  { %v75_v8 = vpop.permute.xlu1 %74   ;;  %v66_v9 = vpop.permute.xlu0 %65  }
  0x81   :  { %153 = vst.msk [vmem:[%s329_s1 + $0x44] ss:$8 sm:$0xf] %vm3_vm0, %v75_v8   ;;  %154 = vst.msk [vmem:[%s329_s1 + $0x44] ss:$8 sm:$0xf0] %vm3_vm0, %v75_v8  }
  0x82   :  { %150 = vst.msk [vmem:[%s329_s1 + $0x4] ss:$8 sm:$0xf] %vm3_vm0, %v66_v9   ;;  %151 = vst.msk [vmem:[%s329_s1 + $0x4] ss:$8 sm:$0xf0] %vm3_vm0, %v66_v9  }
  0x84   :  { %v92_v10 = vpop.permute.xlu1 %91   ;;  %v83_v11 = vpop.permute.xlu0 %82  }
  0x85   :  { %158 = vst.msk [vmem:[%s329_s1 + $0x45] ss:$8 sm:$0xf] %vm3_vm0, %v92_v10   ;;  %159 = vst.msk [vmem:[%s329_s1 + $0x45] ss:$8 sm:$0xf0] %vm3_vm0, %v92_v10  }
  0x86   :  { %155 = vst.msk [vmem:[%s329_s1 + $0x5] ss:$8 sm:$0xf] %vm3_vm0, %v83_v11   ;;  %156 = vst.msk [vmem:[%s329_s1 + $0x5] ss:$8 sm:$0xf0] %vm3_vm0, %v83_v11  }
  0x88   :  { %v109_v12 = vpop.permute.xlu1 %108   ;;  %v100_v13 = vpop.permute.xlu0 %99  }
  0x89   :  { %163 = vst.msk [vmem:[%s329_s1 + $0x46] ss:$8 sm:$0xf] %vm3_vm0, %v109_v12   ;;  %164 = vst.msk [vmem:[%s329_s1 + $0x46] ss:$8 sm:$0xf0] %vm3_vm0, %v109_v12  }
  0x8a   :  { %160 = vst.msk [vmem:[%s329_s1 + $0x6] ss:$8 sm:$0xf] %vm3_vm0, %v100_v13   ;;  %161 = vst.msk [vmem:[%s329_s1 + $0x6] ss:$8 sm:$0xf0] %vm3_vm0, %v100_v13  }
  0x8c   :  { %v126_v14 = vpop.permute.xlu1 %125   ;;  %v117_v15 = vpop.permute.xlu0 %116  }
  0x8d   :  { %168 = vst.msk [vmem:[%s329_s1 + $0x47] ss:$8 sm:$0xf] %vm3_vm0, %v126_v14   ;;  %169 = vst.msk [vmem:[%s329_s1 + $0x47] ss:$8 sm:$0xf0] %vm3_vm0, %v126_v14  }
  0x8e   :  { %165 = vst.msk [vmem:[%s329_s1 + $0x7] ss:$8 sm:$0xf] %vm3_vm0, %v117_v15   ;;  %166 = vst.msk [vmem:[%s329_s1 + $0x7] ss:$8 sm:$0xf0] %vm3_vm0, %v117_v15  }

// kernel: encoder_forward.3
= control target key start
LH: loop header
LB: loop body
LE: loop exit
PB: predicated region body
PF: predicated region fallthrough
CT: control target
= control target key end

     0   :  { %s489_s15 = smov 0   ;;  %s491_s16 = smov 0   ;;  %s535_s0 = inlined_call_operand.vmem [shape: f32[2,8,256], index: 0, kind: input, shape index: {}, may-alias: {0,4}]   ;;  %s536_s1 = inlined_call_operand.vmem [shape: f32[2,8,4], index: 1, kind: input, shape index: {}]   ;;  %s537_s2 = inlined_call_operand.vmem [shape: f32[8,4], index: 2, kind: input, shape index: {}]   ;;  %s538_s3 = inlined_call_operand.vmem [shape: f32[8,2], index: 3, kind: input, shape index: {}]   ;;  %s539_s4 = inlined_call_operand.vmem [shape: f32[2,8,256], index: 4, kind: output, shape index: {}, may-alias: {0,4}]  }
   0x1   :  { %s493_s17 = smov 0  }
   0x2 LB: > { %s26_s3 = sadd.s32 1, %s452_s16  ;;  %p388_p0 = scmp.ge.s32.totalorder %s456_s17, 1  ;;  %s456_s17 = sphi %s493_s17, %s14_s17   ;;  %s452_s16 = sphi %s491_s16, %s541_s16   ;;  %s448_s15 = sphi %s489_s15, %s540_s15  }
   0x3   : > { %p28_p1 = scmp.ge.s32.totalorder %s26_s3, 2  ;;  %p183_p2 = scmp.lt.s32.totalorder %s456_s17, 3 }
   0x5   : > { %s543_s3 = smov (%p28_p1, %s26_s3), 0  ;;  %p184_p3 = pnand %p388_p0, %p183_p2 }
   0x6   : > { %v237_v0 = vld [vmem:[%s536_s1] sm:$0xff] (!%p184_p3)  ;;  %v238_v1 = vld [vmem:[%s536_s1 + $0x8] sm:$0xff] (!%p184_p3)  ;;  %vm239_vm0 = vcmask (!%p184_p3), 31744   ;;  %s458_s22 = smov (!%p184_p3), 1   ;;  %v459_v11 = vmov (!%p184_p3), 2   ;;  %v460_v12 = vmov (!%p184_p3), 0  }
   0x7   : > { %187 = sbr.rel (%p184_p3) target bundleno = 521 (0x209), region = 36  ;;  %v240_v2 = vsel (!%p184_p3), %vm239_vm0, %v237_v0, 0.0  ;;  %v241_v3 = vsel (!%p184_p3), %vm239_vm0, %v238_v1, 0.0  ;;  %428 = vset.pattern.permute.xlu0 (!%p184_p3), %v459_v11  ;;  %427 = vset.pattern.permute.xlu1 (!%p184_p3), %v460_v12  ;;  %s461_s23 = smov (!%p184_p3), 127   ;;  %v243_v14 = vld [vmem:[%s537_s2] sm:$0xff] (!%p184_p3)  ;;  %v462_v18 = vmov (!%p184_p3), 3  }
   0x8   : > { %v242_v4 = vadd.f32 (!%p184_p3), %v241_v3, %v240_v2  ;;  %v463_v19 = vmov (!%p184_p3), 1   ;;  %p218_p4 = scmp.lt.s32.totalorder (!%p184_p3), %s448_s15, 1 }
   0xa   : > { %v244_v5 = vmul.f32 (!%p184_p3), 0.00390625, %v242_v4 }
   0xc   : > { %v245_v6 = vmul.f32 (!%p184_p3), %v244_v5, %v244_v5 }
   0xe   : > { %247 = vrot.lane.b32.xlu0 %v245_v6, %s458_s22  ;;  %s545_s15 = smov (!%p218_p4, %s448_s15), 1 }
   0xf   : > { %s395_s26 = sshll.u32 %s545_s15, 4 }
  0x10   : > { %s225_s29 = scalar_lea.vmem %s535_s0, %s395_s26  ;;  %s235_s6 = scalar_lea.vmem %s539_s4, %s395_s26 }
  0x11   : > { %v265_v23 = vld [vmem:[%s225_s29] sm:$0xff]  ;;  %v266_v27 = vld [vmem:[%s225_s29 + $0x8] sm:$0xff] }
  0x80   : > { %v248_v7 = vpop.permute.xlu0 %247 }
  0x81   : > { %v250_v8 = vsub.f32 %v244_v5, %v248_v7 }
  0x83   : > { %v251_v9 = vmax.f32 %v250_v8, 0.0 }
  0x85   : > { %v252_v10 = vadd.f32 1e-05, %v251_v9 }
  0x87   : > { %432 = vrsqrt.f32 %v252_v10 }
  0x91   : > { %v433_v13 = vpop.eup %432 }
  0x92   : > { %255 = vrot.lane.b32.xlu0 %v433_v13, %s461_s23 }
 0x104   : > { %v256_v15 = vpop.permute.xlu0 %255 }
 0x105   : > { %v258_v16 = vmul.f32 %v256_v15, %v243_v14 }
 0x107   : > { %280 = vperm.xlu0 %428, %v258_v16   ;;  %v259_v17 = vmul.f32 %v258_v16, %v244_v5 }
 0x109   : > { %261 = vrot.lane.b32.xlu1 %v259_v17, %s458_s22 }
 0x10b   : > { %431 = vset.pattern.permute.xlu0 %v462_v18 }
 0x10d   : > { %269 = vperm.xlu1 %427, %v258_v16  }
 0x111   : > { %429 = vset.pattern.permute.xlu1 %v463_v19 }
 0x17b   : > { %v262_v20 = vpop.permute.xlu1 %261 }
 0x17c   : > { %v264_v21 = vsub.f32 %v243_v14, %v262_v20 }
 0x17e   : > { %275 = vperm.xlu1 %429, %v264_v21  }
 0x182   : > { %430 = vset.pattern.permute.xlu1 %v462_v18 }
 0x183   : > { %285 = vperm.xlu1 %430, %v264_v21  }
 0x186   : > { %v281_v26 = vpop.permute.xlu0 %280 }
 0x187   : > { %v283_v30 = vmul.f32 %v281_v26, %v266_v27 }
 0x18c   : > { %v270_v22 = vpop.permute.xlu1 %269 }
 0x18d   : > { %v272_v24 = vmul.f32 %v270_v22, %v265_v23 }
 0x1fd   : > { %v276_v25 = vpop.permute.xlu1 %275 }
 0x1fe   : > { %v278_v28 = vadd.f32 %v276_v25, %v272_v24 }
 0x200   : > { %vm289_vm1 = vcmp.ge.f32.partialorder %v278_v28, 0.0  ;;  %v290_v29 = vmul.f32 0.01, %v278_v28 }
 0x202   : > { %v291_v31 = vsel %vm289_vm1, %v278_v28, %v290_v29  ;;  %v286_v32 = vpop.permute.xlu1 %285 }
 0x203   : > { %292 = vst [vmem:[%s235_s6] sm:$0xff] %v291_v31  ;;  %v288_v33 = vadd.f32 %v286_v32, %v283_v30 }
 0x205   : > { %vm293_vm2 = vcmp.ge.f32.partialorder %v288_v33, 0.0  ;;  %v294_v34 = vmul.f32 0.01, %v288_v33 }
 0x207   : > { %v295_v35 = vsel %vm293_vm2, %v288_v33, %v294_v34 }
 0x208   : > { %296 = vst [vmem:[%s235_s6 + $0x8] sm:$0xff] %v295_v35 }
 0x209 PF: > { %s14_s17 = sadd.s32 1, %s456_s17   ;;  %s540_s15 = smov %s452_s16 }
 0x20a   : > { %p11_p5 = scmp.ge.s32.totalorder %s14_s17, 4   ;;  %s541_s16 = smov %s543_s3 }
 0x20c   :  { %13 = sbr.rel (!%p11_p5) target bundleno = 2 (0x2), region = 66 }

// kernel: encoder_forward.2
= control target key start
LH: loop header
LB: loop body
LE: loop exit
PB: predicated region body
PF: predicated region fallthrough
CT: control target
= control target key end

     0   :  { %s629_s15 = smov 0   ;;  %s631_s16 = smov 0   ;;  %s690_s0 = inlined_call_operand.vmem [shape: f32[2,36,256], index: 0, kind: input, shape index: {}]   ;;  %s691_s1 = inlined_call_operand.vmem [shape: f32[16,36], index: 1, kind: input, shape index: {}]   ;;  %s692_s2 = inlined_call_operand.vmem [shape: f32[8,2], index: 2, kind: input, shape index: {}]   ;;  %s693_s3 = inlined_call_operand.vmem [shape: f32[2,8,256], index: 3, kind: output, shape index: {0}]   ;;  %s694_s4 = inlined_call_operand.vmem [shape: f32[2,8,4], index: 4, kind: output, shape index: {1}]  }
   0x1   :  { %s633_s17 = smov 0  }
   0x2 LB: > { %s27_s18 = sadd.s32 1, %s595_s16  ;;  %p521_p0 = scmp.ge.s32.totalorder %s599_s17, 1  ;;  %s599_s17 = sphi %s633_s17, %s15_s17   ;;  %s595_s16 = sphi %s631_s16, %s696_s16   ;;  %s591_s15 = sphi %s629_s15, %s695_s15  }
   0x3   : > { %p29_p1 = scmp.ge.s32.totalorder %s27_s18, 2  ;;  %p186_p2 = scmp.lt.s32.totalorder %s599_s17, 3 }
   0x5   : > { %s698_s18 = smov (%p29_p1, %s27_s18), 0  ;;  %p187_p3 = pnand %p521_p0, %p186_p2 }
   0x6   : > { %p225_p4 = scmp.lt.s32.totalorder (!%p187_p3), %s591_s15, 1  ;;  %v601_v0 = vmov (!%p187_p3), 0.0   ;;  %v266_v1 = vld [vmem:[%s692_s2] sm:$0xff] (!%p187_p3)  ;;  %v602_v2 = vmov (!%p187_p3), 0   ;;  %vm252_vm0 = vcmask (!%p187_p3), 31744   ;;  %v603_v6 = vmov (!%p187_p3), 1  }
   0x7   : > { %190 = sbr.rel (%p187_p3) target bundleno = 423 (0x1a7), region = 32  ;;  %345 = vmatprep.mubr.f32.mxu0 (!%p187_p3), %v601_v0  ;;  %351 = vmatprep.mubr.f32.mxu1 (!%p187_p3), %v601_v0  ;;  %vm274_vm1 = vcmask (!%p187_p3), 1043456   ;;  %v264_v18 = vld [vmem:[%s691_s1] sm:$0xff] (!%p187_p3)  ;;  %vm267_vm2 = vcmask (!%p187_p3), 293888   ;;  %v265_v19 = vld [vmem:[%s691_s1 + $0x8] sm:$0xff] (!%p187_p3)  ;;  %vm377_vm3 = vcmask (!%p187_p3), 7168  }
   0x8   : > { %575 = vset.pattern.permute.xlu0 (!%p187_p3), %v602_v2  ;;  %vm384_vm4 = vcmask (!%p187_p3), 15368   ;;  %vm390_vm5 = vcmask (!%p187_p3), 23568   ;;  %vm397_vm6 = vcmask (!%p187_p3), 31768  }
   0x9   : > { %361 = vperm.xlu0 (!%p187_p3), %575, %v266_v1  }
   0xd   : > { %576 = vset.pattern.permute.xlu0 (!%p187_p3), %v603_v6 }
   0xe   : > { %s700_s15 = smov (!%p225_p4, %s591_s15), 1  ;;  %367 = vperm.xlu0 %576, %v266_v1  }
   0xf   : > { %s547_s21 = smul.u32 80, %s700_s15  ;;  %s525_s22 = sshll.u32 %s700_s15, 3 }
  0x10   : > { %s657_s25 = scalar_lea.vmem %s694_s4, %s525_s22  ;;  %s532_s7 = sshll.u32 %s700_s15, 4 }
  0x11   : > { %s232_s28 = scalar_lea.vmem %s690_s0, %s547_s21  ;;  %253 = vst.msk [vmem:[%s657_s25] sm:$0xff] %vm252_vm0, %v601_v0  ;;  %s242_s10 = scalar_lea.vmem %s693_s3, %s532_s7 }
  0x12   : > { %v255_v3 = vld [vmem:[%s232_s28 + $0x8] sm:$0xff]  ;;  %v257_v4 = vld [vmem:[%s232_s28 + $0x18] sm:$0xff]  ;;  %v254_v5 = vld [vmem:[%s232_s28] sm:$0xff] }
  0x13   : > { %v533_v7 = vpack.c.bf16 %v257_v4, %v255_v3  ;;  %v256_v8 = vld [vmem:[%s232_s28 + $0x10] sm:$0xff]  ;;  %v259_v9 = vld [vmem:[%s232_s28 + $0x28] sm:$0xff]  ;;  %v261_v10 = vld [vmem:[%s232_s28 + $0x38] sm:$0xff] }
  0x14   : > { %v535_v11 = vpack.c.bf16 %v256_v8, %v254_v5  ;;  %v537_v12 = vpack.c.bf16 %v261_v10, %v259_v9  ;;  %v258_v13 = vld [vmem:[%s232_s28 + $0x20] sm:$0xff]  ;;  %v260_v14 = vld [vmem:[%s232_s28 + $0x30] sm:$0xff]  ;;  %v263_v16 = vld [vmem:[%s232_s28 + $0x48] sm:$0xf] }
  0x15   : > { %534 = vmatprep.subr.bf16.mxu0 %v533_v7  ;;  %541 = vmatprep.subr.bf16.mxu1 %v533_v7  ;;  %v539_v15 = vpack.c.bf16 %v260_v14, %v258_v13  ;;  %v262_v17 = vld [vmem:[%s232_s28 + $0x40] sm:$0xf] }
  0x16   : > { %536 = vmatpush1.bf16.msra.mxu0 %v535_v11  ;;  %544 = vmatpush1.bf16.msra.mxu1 %v535_v11 }
  0x17   : > { %538 = vmatprep.subr.bf16.mxu0 %v537_v12  ;;  %542 = vmatprep.subr.bf16.mxu1 %v537_v12 }
  0x18   : > { %v373_v32 = vld [vmem:[%s657_s25] sm:$0xff] }
  0x1a   : > { %540 = vmatpush1.bf16.msra.mxu0 %v539_v15  ;;  %545 = vmatpush1.bf16.msra.mxu1 %v539_v15 }
  0x1b   : > { %526 = vmatprep.subr.msk.mxu0 %vm274_vm1, %v263_v16  ;;  %543 = vmatprep.subr.msk.mxu1 %vm274_vm1, %v263_v16 }
  0x1e   : > { %527 = vmatpush1.msk.msra.mxu0 %vm274_vm1, %v262_v17  ;;  %546 = vmatpush1.msk.msra.mxu1 %vm274_vm1, %v262_v17 }
  0x1f   : > { %528 = vmatmul.mubr.msk.f32.vlgmr.msra.gmra.mrb[0].mxu0 %vm267_vm2, %v264_v18  ;;  %529 = vmatmul.mubr.msk.f32.vlgmr.msra.gmra.mrb[0].mxu1 %vm267_vm2, %v265_v19 }
  0x88   : > { %v362_v20 = vpop.permute.xlu0 %361 }
  0x8d   : > { %v368_v21 = vpop.permute.xlu0 %367 }
  0xf2   : > { %v347_v22 = vpop.f32.mrb[0].mxu0  ;;  %v353_v23 = vpop.f32.mrb[0].mxu1 }
  0xf3   : > { %v349_v24 = vpop.f32.mrb[1].mxu0  ;;  %v355_v25 = vpop.f32.mrb[1].mxu1 }
  0xf4   : > { %v365_v26 = vadd.f32 %v353_v23, %v349_v24  ;;  %v358_v27 = vsub.f32 %v347_v22, %v355_v25 }
  0xf6   : > { %v364_v28 = vadd.f32 %v362_v20, %v358_v27  ;;  %v370_v29 = vadd.f32 %v368_v21, %v365_v26 }
  0xf8   : > { %371 = vst [vmem:[%s242_s10] sm:$0xff] %v364_v28  ;;  %372 = vst [vmem:[%s242_s10 + $0x8] sm:$0xff] %v370_v29  ;;  %374 = vadd.xlane.f32.xlu1 %v364_v28  ;;  %v393_v30 = vmul.f32 %v370_v29, %v370_v29  ;;  %v380_v31 = vmul.f32 %v364_v28, %v364_v28 }
  0xfa   : > { %394 = vadd.xlane.f32.xlu0 %v393_v30 }
  0xfc   : > { %381 = vadd.xlane.f32.xlu1 %v380_v31 }
 0x100   : > { %387 = vadd.xlane.f32.xlu1 %v370_v29 }
 0x185   : > { %v375_v33 = vpop.xlane.xlu1 %374 }
 0x186   : > { %v376_v34 = vadd.f32 %v375_v33, %v373_v32 }
 0x187   : > { %v395_v41 = vpop.xlane.xlu0 %394 }
 0x188   : > { %378 = vst.msk [vmem:[%s657_s25] sm:$0xff] %vm377_vm3, %v376_v34 }
 0x189   : > { %v382_v36 = vpop.xlane.xlu1 %381 }
 0x18d   : > { %v388_v39 = vpop.xlane.xlu1 %387 }
 0x18f   : > { %v379_v35 = vld [vmem:[%s657_s25] sm:$0xff] }
 0x190   : > { %v383_v37 = vadd.f32 %v382_v36, %v379_v35 }
 0x192   : > { %385 = vst.msk [vmem:[%s657_s25] sm:$0xff] %vm384_vm4, %v383_v37 }
 0x199   : > { %v386_v38 = vld [vmem:[%s657_s25] sm:$0xff] }
 0x19a   : > { %v389_v40 = vadd.f32 %v388_v39, %v386_v38 }
 0x19c   : > { %391 = vst.msk [vmem:[%s657_s25] sm:$0xff] %vm390_vm5, %v389_v40 }
 0x1a3   : > { %v392_v42 = vld [vmem:[%s657_s25] sm:$0xff] }
 0x1a4   : > { %v396_v43 = vadd.f32 %v395_v41, %v392_v42 }
 0x1a6   : > { %398 = vst.msk [vmem:[%s657_s25] sm:$0xff] %vm397_vm6, %v396_v43 }
 0x1a7 PF: > { %s15_s17 = sadd.s32 1, %s599_s17   ;;  %s695_s15 = smov %s595_s16 }
 0x1a8   : > { %p12_p5 = scmp.ge.s32.totalorder %s15_s17, 4   ;;  %s696_s16 = smov %s698_s18 }
 0x1aa   :  { %14 = sbr.rel (!%p12_p5) target bundleno = 2 (0x2), region = 78 }

</bundles_post_ra>
